<compile_context>
chip_gen: v5e
topology: v5e:2x2
jax: 0.10.0
libtpu: 0.0.40
codegen_flags: <defaults>
</compile_context>

<pallas_src>
import functools

import jax
import jax.numpy as jnp
from jax.experimental import pallas as pl
from jax.experimental.pallas import tpu as pltpu


# ----------------------------------------------------------------------------
# Fused kernel: gate -> concat-1x1 -> relu -> 3x3 conv (+bias), one row tile.
# ----------------------------------------------------------------------------
def _fhm_fused_kernel(x1_ref, x2_ref, x3_ref,            # row-tile centers
                      h1_ref, h2_ref, h3_ref,            # [0|row above|row below|0]
                      cm_ref,                            # column validity masks
                      w1_ref, b1_ref, w2_ref, b2_ref, w3_ref, b3_ref,
                      wc1_ref, wc2_ref, wc3_ref, bc_ref,
                      wk_ref, bk_ref,
                      out_ref, *, W):
    f32 = jnp.float32
    tW = out_ref.shape[2]              # tH * W (lane-dense, multiple of 128 or HW)
    Ls = tW + 2 * W + 2                # [0][row above]*W [center]*tW [row below]*W [0]

    # --- pointwise stage on the halo-extended slab (halo rows recomputed) ----
    def group(xc_ref, hal_ref, wp_ref, bp_ref, wc_ref):
        hal = hal_ref[0, 0].astype(f32)                           # (C_i, 2W+2)
        xs = jnp.concatenate([hal[:, :W + 1],                     # zero + row above
                              xc_ref[0].astype(f32),              # center rows
                              hal[:, W + 1:]], axis=1)            # row below + zero
        p = jnp.dot(wp_ref[...], xs, preferred_element_type=f32) + bp_ref[...]
        y = jnp.maximum(p, 0.0) * xs                              # BasicConv(relu) * x
        return jnp.dot(wc_ref[...], y, preferred_element_type=f32)

    z = (group(x1_ref, h1_ref, w1_ref, b1_ref, wc1_ref)
         + group(x2_ref, h2_ref, w2_ref, b2_ref, wc2_ref)
         + group(x3_ref, h3_ref, w3_ref, b3_ref, wc3_ref)
         + bc_ref[...])
    z = jnp.maximum(z, 0.0)                                       # (out_ch, Ls)

    # --- 3x3 conv zero padding: halo rows outside the image must be zero *z*,
    #     not pointwise(0), so zero them after the pointwise stage. -----------
    h = pl.program_id(1)
    lane = jax.lax.broadcasted_iota(jnp.int32, (1, Ls), 1)
    invalid = ((lane <= W) & (h == 0)) | \
              ((lane >= W + 1 + tW) & (h == pl.num_programs(1) - 1))
    z = jnp.where(invalid, 0.0, z)

    left_ok = cm_ref[0:1, :]                                      # (1, tW)
    right_ok = cm_ref[1:2, :]

    # --- 9 taps, packed into one K = 9*out_ch matmul (register accumulation
    #     happens inside the MXU; no VMEM scratch accumulator). ---------------
    taps = []
    for kh in range(3):
        for kw in range(3):
            s0 = W + 1 + (kh - 1) * W + (kw - 1)                  # static start >= 0
            t = z[:, s0:s0 + tW]
            if kw == 0:        # source column w-1: invalid at w == 0
                t = t * left_ok
            elif kw == 2:      # source column w+1: invalid at w == W-1
                t = t * right_ok
            taps.append(t)
    tap_stack = jnp.concatenate(taps, axis=0)                     # (9*out_ch, tW)
    out = jnp.dot(wk_ref[...], tap_stack, preferred_element_type=f32) + bk_ref[...]
    out_ref[0] = out.astype(out_ref.dtype)


# ----------------------------------------------------------------------------
# Host helpers.
# ----------------------------------------------------------------------------
def _halo_rows(x, tH):
    """(N,C,H,W) -> (N, nH, C, 2W+2): per tile [0 | row above | row below | 0].

    Rows outside the image are zeros. Cost ~ 2/tH of the input bytes."""
    N, C, H, W = x.shape
    nH = H // tH
    xr = x.reshape(N, C, nH, tH, W)
    zrow = jnp.zeros((N, C, 1, W), x.dtype)
    top = jnp.concatenate([zrow, xr[:, :, :nH - 1, tH - 1, :]], axis=2)   # row h*tH-1
    bot = jnp.concatenate([xr[:, :, 1:, 0, :], zrow], axis=2)             # row h*tH+tH
    zcol = jnp.zeros((N, C, nH, 1), x.dtype)
    halo = jnp.concatenate([zcol, top, bot, zcol], axis=3)                # (N,C,nH,2W+2)
    return jnp.transpose(halo, (0, 2, 1, 3))                              # (N,nH,C,2W+2)


def _pick_row_tile(H, W, target_lanes):
    """Largest tH dividing H with tH*W a multiple of 128 and <= target lanes.

    Falls back to the smallest legal tile, or the whole image (full-extent
    block is always legal)."""
    best, smallest = None, None
    for tH in range(1, H + 1):
        if H % tH:
            continue
        if (tH * W) % 128 != 0 and tH != H:
            continue
        if smallest is None:
            smallest = tH
        if tH * W <= target_lanes:
            best = tH
    if best is not None:
        return best
    return smallest if smallest is not None else H


# ----------------------------------------------------------------------------
# Parameters (weight layout chosen for the W @ X orientation).
# ----------------------------------------------------------------------------
def make_fhm_params(key, ch1, ch2, ch3, out_ch, dtype=jnp.float32):
    ks = jax.random.split(key, 10)
    scale = 0.1

    def w(k, shape):
        return (scale * jax.random.normal(k, shape)).astype(dtype)

    return dict(
        w_proj1=w(ks[0], (ch1, ch1)), b_proj1=w(ks[1], (ch1, 1)),
        w_proj2=w(ks[2], (ch2, ch2)), b_proj2=w(ks[3], (ch2, 1)),
        w_proj3=w(ks[4], (ch3, ch3)), b_proj3=w(ks[5], (ch3, 1)),
        w_cat=w(ks[6], (out_ch, ch1 + ch2 + ch3)), b_cat=w(ks[7], (out_ch, 1)),
        w_3x3=w(ks[8], (9, out_ch, out_ch)), b_3x3=w(ks[9], (out_ch, 1)),
    )


# ----------------------------------------------------------------------------
# Wrapper: NCHW in, NCHW out.
# ----------------------------------------------------------------------------
@functools.partial(jax.jit, static_argnames=("row_tile", "target_lanes"))
def fhm_forward(x1, x2, x3, params, row_tile=None, target_lanes=8192):
    N, ch1, H, W = x1.shape
    ch2, ch3 = x2.shape[1], x3.shape[1]
    out_ch = params["w_cat"].shape[0]
    HW = H * W
    dtype = x1.dtype

    tH = row_tile if row_tile is not None else _pick_row_tile(H, W, target_lanes)
    assert H % tH == 0 and ((tH * W) % 128 == 0 or tH == H), (tH, H, W)
    nH = H // tH
    tW = tH * W

    # NCHW -> (N, C, H*W): pure reshape, no data movement.
    r1 = x1.reshape(N, ch1, HW)
    r2 = x2.reshape(N, ch2, HW)
    r3 = x3.reshape(N, ch3, HW)

    # Tiny side arrays carrying the 1-row vertical halo per tile.
    hal1 = _halo_rows(x1, tH)
    hal2 = _halo_rows(x2, tH)
    hal3 = _halo_rows(x3, tH)

    # Column-validity masks for the +/-1 lane shifts (flattened layout wraps
    # columns across rows, so left/right edges must be masked).
    col = jnp.arange(tW, dtype=jnp.int32) % W
    colmask = jnp.stack([(col >= 1), (col <= W - 2)], axis=0).astype(jnp.float32)

    # Split the concat-1x1 weight by input channel group; flatten the 3x3
    # taps into one (out_ch, 9*out_ch) contraction.
    wc1 = params["w_cat"][:, :ch1]
    wc2 = params["w_cat"][:, ch1:ch1 + ch2]
    wc3 = params["w_cat"][:, ch1 + ch2:]
    wk = jnp.transpose(params["w_3x3"], (1, 0, 2)).reshape(out_ch, 9 * out_ch)

    def const(shape):
        return pl.BlockSpec(shape, lambda n, h: (0,) * len(shape))

    # TODO(synk): for images where a single row (W lanes) no longer fits the
    # VMEM budget, add a second tiling axis over W with a 1-column halo.
    out_flat = pl.pallas_call(
        functools.partial(_fhm_fused_kernel, W=W),
        out_shape=jax.ShapeDtypeStruct((N, out_ch, HW), dtype),
        grid=(N, nH),
        in_specs=[
            pl.BlockSpec((1, ch1, tW), lambda n, h: (n, 0, h)),
            pl.BlockSpec((1, ch2, tW), lambda n, h: (n, 0, h)),
            pl.BlockSpec((1, ch3, tW), lambda n, h: (n, 0, h)),
            pl.BlockSpec((1, 1, ch1, 2 * W + 2), lambda n, h: (n, h, 0, 0)),
            pl.BlockSpec((1, 1, ch2, 2 * W + 2), lambda n, h: (n, h, 0, 0)),
            pl.BlockSpec((1, 1, ch3, 2 * W + 2), lambda n, h: (n, h, 0, 0)),
            pl.BlockSpec((2, tW), lambda n, h: (0, 0)),
            const((ch1, ch1)), const((ch1, 1)),
            const((ch2, ch2)), const((ch2, 1)),
            const((ch3, ch3)), const((ch3, 1)),
            const((out_ch, ch1)), const((out_ch, ch2)), const((out_ch, ch3)),
            const((out_ch, 1)),
            const((out_ch, 9 * out_ch)), const((out_ch, 1)),
        ],
        out_specs=pl.BlockSpec((1, out_ch, tW), lambda n, h: (n, 0, h)),
        compiler_params=pltpu.CompilerParams(
            dimension_semantics=("parallel", "parallel")),
    )(r1, r2, r3, hal1, hal2, hal3, colmask,
      params["w_proj1"], params["b_proj1"],
      params["w_proj2"], params["b_proj2"],
      params["w_proj3"], params["b_proj3"],
      wc1, wc2, wc3, params["b_cat"],
      wk, params["b_3x3"])

    return out_flat.reshape(N, out_ch, H, W)


# ----------------------------------------------------------------------------
# Pure-JAX reference (mirrors the PyTorch forward exactly) for validation.
# ----------------------------------------------------------------------------
def fhm_reference(x1, x2, x3, params):
    f32 = jnp.float32
    hi = jax.lax.Precision.HIGHEST

    def conv1x1(x, w, b):
        y = jnp.einsum("oc,nchw->nohw", w.astype(f32), x.astype(f32), precision=hi)
        return y + b.reshape(1, -1, 1, 1)

    y1 = jnp.maximum(conv1x1(x1, params["w_proj1"], params["b_proj1"]), 0.0) * x1.astype(f32)
    y2 = jnp.maximum(conv1x1(x2, params["w_proj2"], params["b_proj2"]), 0.0) * x2.astype(f32)
    y3 = jnp.maximum(conv1x1(x3, params["w_proj3"], params["b_proj3"]), 0.0) * x3.astype(f32)
    z = jnp.concatenate([y1, y2, y3], axis=1)
    z = jnp.maximum(conv1x1(z, params["w_cat"], params["b_cat"]), 0.0)

    N, C, H, W = z.shape
    zp = jnp.pad(z, ((0, 0), (0, 0), (1, 1), (1, 1)))
    out = jnp.broadcast_to(params["b_3x3"].astype(f32).reshape(1, -1, 1, 1),
                           (N, params["b_3x3"].shape[0], H, W))
    for kh in range(3):
        for kw in range(3):
            out = out + jnp.einsum("oc,nchw->nohw",
                                   params["w_3x3"][kh * 3 + kw].astype(f32),
                                   zp[:, :, kh:kh + H, kw:kw + W], precision=hi)
    return out


if __name__ == "__main__":
    N, H, W = 2, 16, 16
    ch1, ch2, ch3, out_ch = 4, 8, 4, 16

    key = jax.random.PRNGKey(0)
    k1, k2, k3, kp = jax.random.split(key, 4)
    x1 = jax.random.normal(k1, (N, ch1, H, W), jnp.float32)
    x2 = jax.random.normal(k2, (N, ch2, H, W), jnp.float32)
    x3 = jax.random.normal(k3, (N, ch3, H, W), jnp.float32)
    params = make_fhm_params(kp, ch1, ch2, ch3, out_ch)

    ref = fhm_reference(x1, x2, x3, params)

    # Check both the auto-picked tile (whole image per step) and an explicit
    # 8-row tile (exercises the vertical-halo path).
    for rt in (None, 8):
        out = jax.block_until_ready(fhm_forward(x1, x2, x3, params, row_tile=rt))
        assert out.shape == (N, out_ch, H, W)
        err = float(jnp.max(jnp.abs(out.astype(jnp.float32) - ref)))
        assert err < 2e-3, f"row_tile={rt}: mismatch vs reference, max abs err={err}"

    print("KERNEL_OK")
</pallas_src>

<mosaic_0001>
module attributes {stable_mosaic.version = 11 : i64} {
  func.func @_fhm_fused_kernel(%arg0: i32, %arg1: i32, %arg2: memref<1x4x256xf32, #tpu.memory_space<vmem>>, %arg3: memref<1x8x256xf32, #tpu.memory_space<vmem>>, %arg4: memref<1x4x256xf32, #tpu.memory_space<vmem>>, %arg5: memref<1x1x4x34xf32, #tpu.memory_space<vmem>>, %arg6: memref<1x1x8x34xf32, #tpu.memory_space<vmem>>, %arg7: memref<1x1x4x34xf32, #tpu.memory_space<vmem>>, %arg8: memref<2x256xf32, #tpu.memory_space<vmem>>, %arg9: memref<4x4xf32, #tpu.memory_space<vmem>>, %arg10: memref<4x1xf32, #tpu.memory_space<vmem>>, %arg11: memref<8x8xf32, #tpu.memory_space<vmem>>, %arg12: memref<8x1xf32, #tpu.memory_space<vmem>>, %arg13: memref<4x4xf32, #tpu.memory_space<vmem>>, %arg14: memref<4x1xf32, #tpu.memory_space<vmem>>, %arg15: memref<16x4xf32, #tpu.memory_space<vmem>>, %arg16: memref<16x8xf32, #tpu.memory_space<vmem>>, %arg17: memref<16x4xf32, #tpu.memory_space<vmem>>, %arg18: memref<16x1xf32, #tpu.memory_space<vmem>>, %arg19: memref<16x144xf32, #tpu.memory_space<vmem>>, %arg20: memref<16x1xf32, #tpu.memory_space<vmem>>, %arg21: memref<1x16x256xf32, #tpu.memory_space<vmem>>) attributes {dimension_semantics = [#tpu.dimension_semantics<parallel>, #tpu.dimension_semantics<parallel>], iteration_bounds = array<i64: 2, 1>, scalar_prefetch = 0 : i64, scratch_operands = 0 : i64, tpu.core_type = #tpu.core_type<tc>, window_params = [{transform_indices = @transform_0, window_bounds = array<i64: 1, 4, 256>}, {transform_indices = @transform_1, window_bounds = array<i64: 1, 8, 256>}, {transform_indices = @transform_2, window_bounds = array<i64: 1, 4, 256>}, {transform_indices = @transform_3, window_bounds = array<i64: 1, 1, 4, 34>}, {transform_indices = @transform_4, window_bounds = array<i64: 1, 1, 8, 34>}, {transform_indices = @transform_5, window_bounds = array<i64: 1, 1, 4, 34>}, {pipeline_mode = #tpu.pipeline_mode<synchronous>, transform_indices = @transform_6, window_bounds = array<i64: 2, 256>}, {pipeline_mode = #tpu.pipeline_mode<synchronous>, transform_indices = @transform_7, window_bounds = array<i64: 4, 4>}, {pipeline_mode = #tpu.pipeline_mode<synchronous>, transform_indices = @transform_8, window_bounds = array<i64: 4, 1>}, {pipeline_mode = #tpu.pipeline_mode<synchronous>, transform_indices = @transform_9, window_bounds = array<i64: 8, 8>}, {pipeline_mode = #tpu.pipeline_mode<synchronous>, transform_indices = @transform_10, window_bounds = array<i64: 8, 1>}, {pipeline_mode = #tpu.pipeline_mode<synchronous>, transform_indices = @transform_11, window_bounds = array<i64: 4, 4>}, {pipeline_mode = #tpu.pipeline_mode<synchronous>, transform_indices = @transform_12, window_bounds = array<i64: 4, 1>}, {pipeline_mode = #tpu.pipeline_mode<synchronous>, transform_indices = @transform_13, window_bounds = array<i64: 16, 4>}, {pipeline_mode = #tpu.pipeline_mode<synchronous>, transform_indices = @transform_14, window_bounds = array<i64: 16, 8>}, {pipeline_mode = #tpu.pipeline_mode<synchronous>, transform_indices = @transform_15, window_bounds = array<i64: 16, 4>}, {pipeline_mode = #tpu.pipeline_mode<synchronous>, transform_indices = @transform_16, window_bounds = array<i64: 16, 1>}, {pipeline_mode = #tpu.pipeline_mode<synchronous>, transform_indices = @transform_17, window_bounds = array<i64: 16, 144>}, {pipeline_mode = #tpu.pipeline_mode<synchronous>, transform_indices = @transform_18, window_bounds = array<i64: 16, 1>}, {transform_indices = @transform_19, window_bounds = array<i64: 1, 16, 256>}]} {
    %c0 = arith.constant 0 : index
    %c0_0 = arith.constant 0 : index
    %c0_1 = arith.constant 0 : index
    %c0_2 = arith.constant 0 : index
    %0 = vector.load %arg5[%c0, %c0_0, %c0_1, %c0_2] : memref<1x1x4x34xf32, #tpu.memory_space<vmem>>, vector<1x1x4x34xf32>
    %1 = vector.shape_cast %0 : vector<1x1x4x34xf32> to vector<4x34xf32>
    %2 = vector.extract_strided_slice %1 {offsets = [0, 0], sizes = [4, 17], strides = [1, 1]} : vector<4x34xf32> to vector<4x17xf32>
    %c0_3 = arith.constant 0 : index
    %c0_4 = arith.constant 0 : index
    %c0_5 = arith.constant 0 : index
    %3 = vector.load %arg2[%c0_3, %c0_4, %c0_5] : memref<1x4x256xf32, #tpu.memory_space<vmem>>, vector<1x4x256xf32>
    %4 = vector.shape_cast %3 : vector<1x4x256xf32> to vector<4x256xf32>
    %5 = vector.extract_strided_slice %1 {offsets = [0, 17], sizes = [4, 17], strides = [1, 1]} : vector<4x34xf32> to vector<4x17xf32>
    %6 = tpu.concatenate %2, %4, %5 in 1 : vector<4x17xf32>, vector<4x256xf32>, vector<4x17xf32> -> vector<4x290xf32>
    %c0_6 = arith.constant 0 : index
    %c0_7 = arith.constant 0 : index
    %7 = vector.load %arg9[%c0_6, %c0_7] : memref<4x4xf32, #tpu.memory_space<vmem>>, vector<4x4xf32>
    %cst = arith.constant dense<0.000000e+00> : vector<4x290xf32>
    %8 = tpu.matmul %7, %6, %cst {dimension_numbers = #tpu.dot_dimension_numbers<[1], [0], [0], [1], [0, 0, 1, 1], [], []>} : vector<4x4xf32>, vector<4x290xf32>, vector<4x290xf32> -> vector<4x290xf32>
    %c0_8 = arith.constant 0 : index
    %c0_9 = arith.constant 0 : index
    %9 = vector.load %arg10[%c0_8, %c0_9] : memref<4x1xf32, #tpu.memory_space<vmem>>, vector<4x1xf32>
    %10 = vector.broadcast %9 : vector<4x1xf32> to vector<4x290xf32>
    %11 = arith.addf %8, %10 : vector<4x290xf32>
    %cst_10 = arith.constant 0.000000e+00 : f32
    %12 = vector.broadcast %cst_10 : f32 to vector<4x290xf32>
    %13 = arith.maximumf %11, %12 : vector<4x290xf32>
    %14 = arith.mulf %13, %6 : vector<4x290xf32>
    %c0_11 = arith.constant 0 : index
    %c0_12 = arith.constant 0 : index
    %15 = vector.load %arg15[%c0_11, %c0_12] : memref<16x4xf32, #tpu.memory_space<vmem>>, vector<16x4xf32>
    %cst_13 = arith.constant dense<0.000000e+00> : vector<16x290xf32>
    %16 = tpu.matmul %15, %14, %cst_13 {dimension_numbers = #tpu.dot_dimension_numbers<[1], [0], [0], [1], [0, 0, 1, 1], [], []>} : vector<16x4xf32>, vector<4x290xf32>, vector<16x290xf32> -> vector<16x290xf32>
    %c0_14 = arith.constant 0 : index
    %c0_15 = arith.constant 0 : index
    %c0_16 = arith.constant 0 : index
    %c0_17 = arith.constant 0 : index
    %17 = vector.load %arg6[%c0_14, %c0_15, %c0_16, %c0_17] : memref<1x1x8x34xf32, #tpu.memory_space<vmem>>, vector<1x1x8x34xf32>
    %18 = vector.shape_cast %17 : vector<1x1x8x34xf32> to vector<8x34xf32>
    %19 = vector.extract_strided_slice %18 {offsets = [0, 0], sizes = [8, 17], strides = [1, 1]} : vector<8x34xf32> to vector<8x17xf32>
    %c0_18 = arith.constant 0 : index
    %c0_19 = arith.constant 0 : index
    %c0_20 = arith.constant 0 : index
    %20 = vector.load %arg3[%c0_18, %c0_19, %c0_20] : memref<1x8x256xf32, #tpu.memory_space<vmem>>, vector<1x8x256xf32>
    %21 = vector.shape_cast %20 : vector<1x8x256xf32> to vector<8x256xf32>
    %22 = vector.extract_strided_slice %18 {offsets = [0, 17], sizes = [8, 17], strides = [1, 1]} : vector<8x34xf32> to vector<8x17xf32>
    %23 = tpu.concatenate %19, %21, %22 in 1 : vector<8x17xf32>, vector<8x256xf32>, vector<8x17xf32> -> vector<8x290xf32>
    %c0_21 = arith.constant 0 : index
    %c0_22 = arith.constant 0 : index
    %24 = vector.load %arg11[%c0_21, %c0_22] : memref<8x8xf32, #tpu.memory_space<vmem>>, vector<8x8xf32>
    %cst_23 = arith.constant dense<0.000000e+00> : vector<8x290xf32>
    %25 = tpu.matmul %24, %23, %cst_23 {dimension_numbers = #tpu.dot_dimension_numbers<[1], [0], [0], [1], [0, 0, 1, 1], [], []>} : vector<8x8xf32>, vector<8x290xf32>, vector<8x290xf32> -> vector<8x290xf32>
    %c0_24 = arith.constant 0 : index
    %c0_25 = arith.constant 0 : index
    %26 = vector.load %arg12[%c0_24, %c0_25] : memref<8x1xf32, #tpu.memory_space<vmem>>, vector<8x1xf32>
    %27 = vector.broadcast %26 : vector<8x1xf32> to vector<8x290xf32>
    %28 = arith.addf %25, %27 : vector<8x290xf32>
    %cst_26 = arith.constant 0.000000e+00 : f32
    %29 = vector.broadcast %cst_26 : f32 to vector<8x290xf32>
    %30 = arith.maximumf %28, %29 : vector<8x290xf32>
    %31 = arith.mulf %30, %23 : vector<8x290xf32>
    %c0_27 = arith.constant 0 : index
    %c0_28 = arith.constant 0 : index
    %32 = vector.load %arg16[%c0_27, %c0_28] : memref<16x8xf32, #tpu.memory_space<vmem>>, vector<16x8xf32>
    %cst_29 = arith.constant dense<0.000000e+00> : vector<16x290xf32>
    %33 = tpu.matmul %32, %31, %cst_29 {dimension_numbers = #tpu.dot_dimension_numbers<[1], [0], [0], [1], [0, 0, 1, 1], [], []>} : vector<16x8xf32>, vector<8x290xf32>, vector<16x290xf32> -> vector<16x290xf32>
    %34 = arith.addf %16, %33 : vector<16x290xf32>
    %c0_30 = arith.constant 0 : index
    %c0_31 = arith.constant 0 : index
    %c0_32 = arith.constant 0 : index
    %c0_33 = arith.constant 0 : index
    %35 = vector.load %arg7[%c0_30, %c0_31, %c0_32, %c0_33] : memref<1x1x4x34xf32, #tpu.memory_space<vmem>>, vector<1x1x4x34xf32>
    %36 = vector.shape_cast %35 : vector<1x1x4x34xf32> to vector<4x34xf32>
    %37 = vector.extract_strided_slice %36 {offsets = [0, 0], sizes = [4, 17], strides = [1, 1]} : vector<4x34xf32> to vector<4x17xf32>
    %c0_34 = arith.constant 0 : index
    %c0_35 = arith.constant 0 : index
    %c0_36 = arith.constant 0 : index
    %38 = vector.load %arg4[%c0_34, %c0_35, %c0_36] : memref<1x4x256xf32, #tpu.memory_space<vmem>>, vector<1x4x256xf32>
    %39 = vector.shape_cast %38 : vector<1x4x256xf32> to vector<4x256xf32>
    %40 = vector.extract_strided_slice %36 {offsets = [0, 17], sizes = [4, 17], strides = [1, 1]} : vector<4x34xf32> to vector<4x17xf32>
    %41 = tpu.concatenate %37, %39, %40 in 1 : vector<4x17xf32>, vector<4x256xf32>, vector<4x17xf32> -> vector<4x290xf32>
    %c0_37 = arith.constant 0 : index
    %c0_38 = arith.constant 0 : index
    %42 = vector.load %arg13[%c0_37, %c0_38] : memref<4x4xf32, #tpu.memory_space<vmem>>, vector<4x4xf32>
    %cst_39 = arith.constant dense<0.000000e+00> : vector<4x290xf32>
    %43 = tpu.matmul %42, %41, %cst_39 {dimension_numbers = #tpu.dot_dimension_numbers<[1], [0], [0], [1], [0, 0, 1, 1], [], []>} : vector<4x4xf32>, vector<4x290xf32>, vector<4x290xf32> -> vector<4x290xf32>
    %c0_40 = arith.constant 0 : index
    %c0_41 = arith.constant 0 : index
    %44 = vector.load %arg14[%c0_40, %c0_41] : memref<4x1xf32, #tpu.memory_space<vmem>>, vector<4x1xf32>
    %45 = vector.broadcast %44 : vector<4x1xf32> to vector<4x290xf32>
    %46 = arith.addf %43, %45 : vector<4x290xf32>
    %cst_42 = arith.constant 0.000000e+00 : f32
    %47 = vector.broadcast %cst_42 : f32 to vector<4x290xf32>
    %48 = arith.maximumf %46, %47 : vector<4x290xf32>
    %49 = arith.mulf %48, %41 : vector<4x290xf32>
    %c0_43 = arith.constant 0 : index
    %c0_44 = arith.constant 0 : index
    %50 = vector.load %arg17[%c0_43, %c0_44] : memref<16x4xf32, #tpu.memory_space<vmem>>, vector<16x4xf32>
    %cst_45 = arith.constant dense<0.000000e+00> : vector<16x290xf32>
    %51 = tpu.matmul %50, %49, %cst_45 {dimension_numbers = #tpu.dot_dimension_numbers<[1], [0], [0], [1], [0, 0, 1, 1], [], []>} : vector<16x4xf32>, vector<4x290xf32>, vector<16x290xf32> -> vector<16x290xf32>
    %52 = arith.addf %34, %51 : vector<16x290xf32>
    %c0_46 = arith.constant 0 : index
    %c0_47 = arith.constant 0 : index
    %53 = vector.load %arg18[%c0_46, %c0_47] : memref<16x1xf32, #tpu.memory_space<vmem>>, vector<16x1xf32>
    %54 = vector.broadcast %53 : vector<16x1xf32> to vector<16x290xf32>
    %55 = arith.addf %52, %54 : vector<16x290xf32>
    %cst_48 = arith.constant 0.000000e+00 : f32
    %56 = vector.broadcast %cst_48 : f32 to vector<16x290xf32>
    %57 = arith.maximumf %55, %56 : vector<16x290xf32>
    %58 = tpu.iota {dimensions = array<i32: 1>} : vector<1x290xi32>
    %c16_i32 = arith.constant 16 : i32
    %59 = vector.broadcast %c16_i32 : i32 to vector<1x290xi32>
    %60 = arith.cmpi sle, %58, %59 : vector<1x290xi32>
    %c0_i32 = arith.constant 0 : i32
    %61 = arith.cmpi eq, %arg1, %c0_i32 : i32
    %62 = vector.broadcast %61 : i1 to vector<1x290xi1>
    %63 = arith.andi %60, %62 : vector<1x290xi1>
    %c273_i32 = arith.constant 273 : i32
    %64 = vector.broadcast %c273_i32 : i32 to vector<1x290xi32>
    %65 = arith.cmpi sge, %58, %64 : vector<1x290xi32>
    %c0_i32_49 = arith.constant 0 : i32
    %66 = arith.cmpi eq, %arg1, %c0_i32_49 : i32
    %67 = vector.broadcast %66 : i1 to vector<1x290xi1>
    %68 = arith.andi %65, %67 : vector<1x290xi1>
    %69 = arith.ori %63, %68 : vector<1x290xi1>
    %cst_50 = arith.constant 0.000000e+00 : f32
    %70 = vector.shape_cast %69 : vector<1x290xi1> to vector<1x290xi1>
    %71 = vector.broadcast %70 : vector<1x290xi1> to vector<16x290xi1>
    %72 = vector.broadcast %cst_50 : f32 to vector<16x290xf32>
    %73 = arith.select %71, %72, %57 : vector<16x290xi1>, vector<16x290xf32>
    %c0_51 = arith.constant 0 : index
    %c0_52 = arith.constant 0 : index
    %74 = vector.load %arg8[%c0_51, %c0_52] : memref<2x256xf32, #tpu.memory_space<vmem>>, vector<1x256xf32>
    %c1 = arith.constant 1 : index
    %c0_53 = arith.constant 0 : index
    %75 = vector.load %arg8[%c1, %c0_53] : memref<2x256xf32, #tpu.memory_space<vmem>>, vector<1x256xf32>
    %76 = vector.extract_strided_slice %73 {offsets = [0, 0], sizes = [16, 256], strides = [1, 1]} : vector<16x290xf32> to vector<16x256xf32>
    %77 = vector.broadcast %74 : vector<1x256xf32> to vector<16x256xf32>
    %78 = arith.mulf %76, %77 : vector<16x256xf32>
    %79 = vector.extract_strided_slice %73 {offsets = [0, 1], sizes = [16, 256], strides = [1, 1]} : vector<16x290xf32> to vector<16x256xf32>
    %80 = vector.extract_strided_slice %73 {offsets = [0, 2], sizes = [16, 256], strides = [1, 1]} : vector<16x290xf32> to vector<16x256xf32>
    %81 = vector.broadcast %75 : vector<1x256xf32> to vector<16x256xf32>
    %82 = arith.mulf %80, %81 : vector<16x256xf32>
    %83 = vector.extract_strided_slice %73 {offsets = [0, 16], sizes = [16, 256], strides = [1, 1]} : vector<16x290xf32> to vector<16x256xf32>
    %84 = vector.broadcast %74 : vector<1x256xf32> to vector<16x256xf32>
    %85 = arith.mulf %83, %84 : vector<16x256xf32>
    %86 = vector.extract_strided_slice %73 {offsets = [0, 17], sizes = [16, 256], strides = [1, 1]} : vector<16x290xf32> to vector<16x256xf32>
    %87 = vector.extract_strided_slice %73 {offsets = [0, 18], sizes = [16, 256], strides = [1, 1]} : vector<16x290xf32> to vector<16x256xf32>
    %88 = vector.broadcast %75 : vector<1x256xf32> to vector<16x256xf32>
    %89 = arith.mulf %87, %88 : vector<16x256xf32>
    %90 = vector.extract_strided_slice %73 {offsets = [0, 32], sizes = [16, 256], strides = [1, 1]} : vector<16x290xf32> to vector<16x256xf32>
    %91 = vector.broadcast %74 : vector<1x256xf32> to vector<16x256xf32>
    %92 = arith.mulf %90, %91 : vector<16x256xf32>
    %93 = vector.extract_strided_slice %73 {offsets = [0, 33], sizes = [16, 256], strides = [1, 1]} : vector<16x290xf32> to vector<16x256xf32>
    %94 = vector.extract_strided_slice %73 {offsets = [0, 34], sizes = [16, 256], strides = [1, 1]} : vector<16x290xf32> to vector<16x256xf32>
    %95 = vector.broadcast %75 : vector<1x256xf32> to vector<16x256xf32>
    %96 = arith.mulf %94, %95 : vector<16x256xf32>
    %97 = tpu.concatenate %78, %79, %82, %85, %86, %89, %92, %93, %96 in 0 : vector<16x256xf32>, vector<16x256xf32>, vector<16x256xf32>, vector<16x256xf32>, vector<16x256xf32>, vector<16x256xf32>, vector<16x256xf32>, vector<16x256xf32>, vector<16x256xf32> -> vector<144x256xf32>
    %c0_54 = arith.constant 0 : index
    %c0_55 = arith.constant 0 : index
    %98 = vector.load %arg19[%c0_54, %c0_55] : memref<16x144xf32, #tpu.memory_space<vmem>>, vector<16x144xf32>
    %cst_56 = arith.constant dense<0.000000e+00> : vector<16x256xf32>
    %99 = tpu.matmul %98, %97, %cst_56 {dimension_numbers = #tpu.dot_dimension_numbers<[1], [0], [0], [1], [0, 0, 1, 1], [], []>} : vector<16x144xf32>, vector<144x256xf32>, vector<16x256xf32> -> vector<16x256xf32>
    %c0_57 = arith.constant 0 : index
    %c0_58 = arith.constant 0 : index
    %100 = vector.load %arg20[%c0_57, %c0_58] : memref<16x1xf32, #tpu.memory_space<vmem>>, vector<16x1xf32>
    %101 = vector.broadcast %100 : vector<16x1xf32> to vector<16x256xf32>
    %102 = arith.addf %99, %101 : vector<16x256xf32>
    %c0_59 = arith.constant 0 : index
    %c0_60 = arith.constant 0 : index
    %c0_61 = arith.constant 0 : index
    %103 = vector.load %arg21[%c0_59, %c0_60, %c0_61] : memref<1x16x256xf32, #tpu.memory_space<vmem>>, vector<1x16x256xf32>
    %104 = vector.shape_cast %103 : vector<1x16x256xf32> to vector<16x256xf32>
    %105 = vector.shape_cast %102 : vector<16x256xf32> to vector<1x16x256xf32>
    tpu.vector_store %arg21[%c0_59, %c0_60, %c0_61], %105 {strides = array<i32>} : memref<1x16x256xf32, #tpu.memory_space<vmem>>, vector<1x16x256xf32>,
    return
  }
  func.func @transform_0(%arg0: i32, %arg1: i32) -> (i32, i32, i32) {
    %c0_i32 = arith.constant 0 : i32
    %c0_i32_0 = arith.constant 0 : i32
    return %arg0, %c0_i32, %arg1 : i32, i32, i32
  }
  func.func @transform_1(%arg0: i32, %arg1: i32) -> (i32, i32, i32) {
    %c0_i32 = arith.constant 0 : i32
    %c0_i32_0 = arith.constant 0 : i32
    return %arg0, %c0_i32, %arg1 : i32, i32, i32
  }
  func.func @transform_2(%arg0: i32, %arg1: i32) -> (i32, i32, i32) {
    %c0_i32 = arith.constant 0 : i32
    %c0_i32_0 = arith.constant 0 : i32
    return %arg0, %c0_i32, %arg1 : i32, i32, i32
  }
  func.func @transform_3(%arg0: i32, %arg1: i32) -> (i32, i32, i32, i32) {
    %c0_i32 = arith.constant 0 : i32
    %c0_i32_0 = arith.constant 0 : i32
    %c0_i32_1 = arith.constant 0 : i32
    return %arg0, %arg1, %c0_i32, %c0_i32_0 : i32, i32, i32, i32
  }
  func.func @transform_4(%arg0: i32, %arg1: i32) -> (i32, i32, i32, i32) {
    %c0_i32 = arith.constant 0 : i32
    %c0_i32_0 = arith.constant 0 : i32
    %c0_i32_1 = arith.constant 0 : i32
    return %arg0, %arg1, %c0_i32, %c0_i32_0 : i32, i32, i32, i32
  }
  func.func @transform_5(%arg0: i32, %arg1: i32) -> (i32, i32, i32, i32) {
    %c0_i32 = arith.constant 0 : i32
    %c0_i32_0 = arith.constant 0 : i32
    %c0_i32_1 = arith.constant 0 : i32
    return %arg0, %arg1, %c0_i32, %c0_i32_0 : i32, i32, i32, i32
  }
  func.func @transform_6(%arg0: i32, %arg1: i32) -> (i32, i32) {
    %c0_i32 = arith.constant 0 : i32
    %c0_i32_0 = arith.constant 0 : i32
    %c0_i32_1 = arith.constant 0 : i32
    return %c0_i32, %c0_i32_0 : i32, i32
  }
  func.func @transform_7(%arg0: i32, %arg1: i32) -> (i32, i32) {
    %c0_i32 = arith.constant 0 : i32
    %c0_i32_0 = arith.constant 0 : i32
    %c0_i32_1 = arith.constant 0 : i32
    return %c0_i32, %c0_i32_0 : i32, i32
  }
  func.func @transform_8(%arg0: i32, %arg1: i32) -> (i32, i32) {
    %c0_i32 = arith.constant 0 : i32
    %c0_i32_0 = arith.constant 0 : i32
    %c0_i32_1 = arith.constant 0 : i32
    return %c0_i32, %c0_i32_0 : i32, i32
  }
  func.func @transform_9(%arg0: i32, %arg1: i32) -> (i32, i32) {
    %c0_i32 = arith.constant 0 : i32
    %c0_i32_0 = arith.constant 0 : i32
    %c0_i32_1 = arith.constant 0 : i32
    return %c0_i32, %c0_i32_0 : i32, i32
  }
  func.func @transform_10(%arg0: i32, %arg1: i32) -> (i32, i32) {
    %c0_i32 = arith.constant 0 : i32
    %c0_i32_0 = arith.constant 0 : i32
    %c0_i32_1 = arith.constant 0 : i32
    return %c0_i32, %c0_i32_0 : i32, i32
  }
  func.func @transform_11(%arg0: i32, %arg1: i32) -> (i32, i32) {
    %c0_i32 = arith.constant 0 : i32
    %c0_i32_0 = arith.constant 0 : i32
    %c0_i32_1 = arith.constant 0 : i32
    return %c0_i32, %c0_i32_0 : i32, i32
  }
  func.func @transform_12(%arg0: i32, %arg1: i32) -> (i32, i32) {
    %c0_i32 = arith.constant 0 : i32
    %c0_i32_0 = arith.constant 0 : i32
    %c0_i32_1 = arith.constant 0 : i32
    return %c0_i32, %c0_i32_0 : i32, i32
  }
  func.func @transform_13(%arg0: i32, %arg1: i32) -> (i32, i32) {
    %c0_i32 = arith.constant 0 : i32
    %c0_i32_0 = arith.constant 0 : i32
    %c0_i32_1 = arith.constant 0 : i32
    return %c0_i32, %c0_i32_0 : i32, i32
  }
  func.func @transform_14(%arg0: i32, %arg1: i32) -> (i32, i32) {
    %c0_i32 = arith.constant 0 : i32
    %c0_i32_0 = arith.constant 0 : i32
    %c0_i32_1 = arith.constant 0 : i32
    return %c0_i32, %c0_i32_0 : i32, i32
  }
  func.func @transform_15(%arg0: i32, %arg1: i32) -> (i32, i32) {
    %c0_i32 = arith.constant 0 : i32
    %c0_i32_0 = arith.constant 0 : i32
    %c0_i32_1 = arith.constant 0 : i32
    return %c0_i32, %c0_i32_0 : i32, i32
  }
  func.func @transform_16(%arg0: i32, %arg1: i32) -> (i32, i32) {
    %c0_i32 = arith.constant 0 : i32
    %c0_i32_0 = arith.constant 0 : i32
    %c0_i32_1 = arith.constant 0 : i32
    return %c0_i32, %c0_i32_0 : i32, i32
  }
  func.func @transform_17(%arg0: i32, %arg1: i32) -> (i32, i32) {
    %c0_i32 = arith.constant 0 : i32
    %c0_i32_0 = arith.constant 0 : i32
    %c0_i32_1 = arith.constant 0 : i32
    return %c0_i32, %c0_i32_0 : i32, i32
  }
  func.func @transform_18(%arg0: i32, %arg1: i32) -> (i32, i32) {
    %c0_i32 = arith.constant 0 : i32
    %c0_i32_0 = arith.constant 0 : i32
    %c0_i32_1 = arith.constant 0 : i32
    return %c0_i32, %c0_i32_0 : i32, i32
  }
  func.func @transform_19(%arg0: i32, %arg1: i32) -> (i32, i32, i32) {
    %c0_i32 = arith.constant 0 : i32
    %c0_i32_0 = arith.constant 0 : i32
    return %arg0, %c0_i32, %arg1 : i32, i32, i32
  }
}

</mosaic_0001>

<bundles_post_ra>
// kernel: fhm_forward.1
= control target key start
LH: loop header
LB: loop body
LE: loop exit
PB: predicated region body
PF: predicated region fallthrough
CT: control target
= control target key end

     0   :  { %s2356_s30 = smov 0   ;;  %s2358_s20 = smov 0   ;;  %s2719_s0 = inlined_call_operand.vmem [shape: f32[2,4,256], index: 0, kind: input, shape index: {}]   ;;  %s2720_s1 = inlined_call_operand.vmem [shape: f32[2,8,256], index: 1, kind: input, shape index: {}]   ;;  %s2721_s2 = inlined_call_operand.vmem [shape: f32[2,4,256], index: 2, kind: input, shape index: {}]   ;;  %s2722_s3 = inlined_call_operand.vmem [shape: f32[2,1,4,34], index: 3, kind: input, shape index: {}, may-alias: {3,5}]   ;;  %s2723_s4 = inlined_call_operand.vmem [shape: f32[2,1,8,34], index: 4, kind: input, shape index: {}]   ;;  %s2724_s5 = inlined_call_operand.vmem [shape: f32[2,1,4,34], index: 5, kind: input, shape index: {}, may-alias: {3,5}]   ;;  %s2725_s6 = inlined_call_operand.vmem [shape: f32[2,256], index: 6, kind: input, shape index: {}]   ;;  %s2726_s7 = inlined_call_operand.vmem [shape: f32[4,4], index: 7, kind: input, shape index: {}]   ;;  %s2727_s8 = inlined_call_operand.vmem [shape: f32[4,1], index: 8, kind: input, shape index: {}]   ;;  %s2728_s9 = inlined_call_operand.vmem [shape: f32[8,8], index: 9, kind: input, shape index: {}]   ;;  %s2729_s10 = inlined_call_operand.vmem [shape: f32[8,1], index: 10, kind: input, shape index: {}]   ;;  %s2730_s11 = inlined_call_operand.vmem [shape: f32[4,4], index: 11, kind: input, shape index: {}]   ;;  %s2731_s12 = inlined_call_operand.vmem [shape: f32[4,1], index: 12, kind: input, shape index: {}]   ;;  %s2732_s13 = inlined_call_operand.vmem [shape: f32[16,4], index: 13, kind: input, shape index: {}]   ;;  %s2733_s14 = inlined_call_operand.vmem [shape: f32[16,8], index: 14, kind: input, shape index: {}]   ;;  %s2734_s15 = inlined_call_operand.vmem [shape: f32[16,4], index: 15, kind: input, shape index: {}]   ;;  %s2735_s16 = inlined_call_operand.vmem [shape: f32[16,1], index: 16, kind: input, shape index: {}]   ;;  %s2736_s17 = inlined_call_operand.vmem [shape: f32[16,144], index: 17, kind: input, shape index: {}]   ;;  %s2737_s18 = inlined_call_operand.vmem [shape: f32[16,1], index: 18, kind: input, shape index: {}]   ;;  %s2738_s19 = inlined_call_operand.vmem [shape: f32[2,16,256], index: 19, kind: output, shape index: {}]  }
   0x1   :  { %2741 = sst [smem:[#allocation5_spill]] %s2719_s0  ;;  %s2354_s0 = smov 0  }
   0x2   :  { %2742 = sst [smem:[#allocation6_spill]] %s2720_s1 }
   0x3   :  { %2743 = sst [smem:[#allocation7_spill]] %s2721_s2 }
   0x4   :  { %2744 = sst [smem:[#allocation8_spill]] %s2722_s3 }
   0x5   :  { %2745 = sst [smem:[#allocation9_spill]] %s2738_s19 }
   0x6 LB: > { %2746 = sst [smem:[#allocation2_spill]] %s2233_s30  ;;  %s41_s21 = sadd.s32 1, %s2233_s30  ;;  %s2237_s20 = sphi %s2358_s20, %s29_s20   ;;  %s2233_s30 = sphi %s2356_s30, %s2756_s30   ;;  %s2229_s0 = sphi %s2354_s0, %s2755_s0  }
   0x7   : > { %2747 = sst [smem:[#allocation3_spill]] %s2237_s20  ;;  %p1991_p0 = scmp.ge.s32.totalorder %s2237_s20, 1 }
   0x8   : > { %p43_p1 = scmp.ge.s32.totalorder %s41_s21, 2  ;;  %p634_p2 = scmp.lt.s32.totalorder %s2237_s20, 3 }
   0xa   : > { %s2758_s21 = smov (%p43_p1, %s41_s21), 0  ;;  %p635_p3 = pnand %p1991_p0, %p634_p2 }
   0xb   : > { %2748 = sst [smem:[#allocation4_spill]] %s2758_s21  ;;  %p738_p4 = scmp.lt.s32.totalorder (!%p635_p3), %s2229_s0, 1 }
   0xc   : > { %638 = sbr.rel (%p635_p3) target bundleno = 916 (0x394), region = 96  ;;  %s2749_s24 = sld [smem:[#allocation6_spill]] (!%p635_p3) }
   0xd   : > { %s2750_s27 = sld [smem:[#allocation5_spill]] (!%p635_p3)  ;;  %s2239_s29 = smov (!%p635_p3), 17  }
   0xe   : > { %s2751_s20 = sld [smem:[#allocation7_spill]] (!%p635_p3)  ;;  %s2241_s26 = smov (!%p635_p3), 32  }
   0xf   : > { %s2247_s21 = smov (!%p635_p3), 111   ;;  %s2248_s23 = smov (!%p635_p3), 96  }
  0x10   : > { %s2251_s3 = smov (!%p635_p3), 112  }
  0x11   : > { %s2760_s0 = smov (!%p738_p4, %s2229_s0), 1  ;;  %v919_v6 = vld [vmem:[%s2729_s10] sm:$0xff]  ;;  %v2240_v8 = vmov 0   ;;  %vm808_vm0 = vcmask 138240   ;;  %vm826_vm1 = vcmask 1043456   ;;  %vm822_vm2 = vcmask 31744  }
  0x12   : > { %s2050_s1 = sshll.u32 %s2760_s0, 4  ;;  %s2376_s22 = sshll.u32 %s2760_s0, 3  ;;  %2092 = vset.pattern.permute.xlu2 %v2240_v8  ;;  %2094 = vset.pattern.permute.xlu1 %v2240_v8  ;;  %v816_v11 = vld [vmem:[%s2727_s8] sm:$0xf]  ;;  %vm925_vm3 = vcmask 64512   ;;  %v996_v42 = vld [vmem:[%s2733_s14 + $0x8] sm:$0xff] }
  0x13   : > { %s755_s25 = scalar_lea.vmem %s2749_s24, %s2050_s1  ;;  %s745_s28 = scalar_lea.vmem %s2750_s27, %s2376_s22  ;;  %922 = vperm.xlu2 %2092, %v919_v6   ;;  %2093 = vset.pattern.permute.xlu0 %v2240_v8  ;;  %v815_v15 = vld [vmem:[%s2726_s7] sm:$0xf]  ;;  %v902_v43 = vld [vmem:[%s2732_s13 + $0x8] sm:$0xff]  ;;  %vm1471_vm6 = vcmask 261120   ;;  %vm1456_vm7 = vcmask 146432   ;;  %vm1441_vm8 = vcmask 130048  }
  0x14   : > { %v905_v0 = vld [vmem:[%s755_s25 + $0x8] sm:$0xff]  ;;  %v799_v1 = vld [vmem:[%s745_s28] sm:$0xff]  ;;  %s765_s19 = scalar_lea.vmem %s2751_s20, %s2376_s22  ;;  %s2752_s24 = sld [smem:[#allocation8_spill]]  ;;  %vm1426_vm9 = vcmask 15360   ;;  %vm1486_vm10 = vcmask 277504   ;;  %vm1665_vm11 = vcmask 777216  }
  0x15   : > { %910 = vrot.lane.b32.xlu1 %v905_v0, %s2239_s29  ;;  %801 = vst [vmem:[#allocation1] ss:$2 sm:$0xff] %v799_v1  ;;  %v904_v2 = vld [vmem:[%s755_s25] sm:$0xff]  ;;  %s780_s20 = scalar_lea.vmem %s2723_s4, %s2376_s22  ;;  %v1349_v0 = vld [vmem:[%s2735_s16 + $0x8] sm:$0xff]  ;;  %s2242_s27 = smov 18   ;;  %vm1644_vm12 = vcmask 785408  }
  0x16   : > { %v1157_v3 = vld [vmem:[%s765_s19] sm:$0xff]  ;;  %s1998_s19 = sshll.u32 %s2760_s0, 2  ;;  %s2243_s28 = smov 16   ;;  %vm1617_vm13 = vcmask 900096   ;;  %vm1590_vm14 = vcmask 908288   ;;  %vm1569_vm15 = vcmask 916480  }
  0x17   : > { %v918_v16 = vld [vmem:[%s2728_s9] sm:$0xff]  ;;  %s787_s1 = scalar_lea.vmem %s2724_s5, %s1998_s19  ;;  %s2246_s22 = smov 95  }
  0x18   : > { %v1173_v19 = vld [vmem:[%s2731_s12] sm:$0xf] }
  0x19   : > { %v903_v20 = vld [vmem:[%s780_s20] sm:$0xff] }
  0x1a   : > { %s773_s25 = scalar_lea.vmem %s2752_s24, %s1998_s19  ;;  %v995_v38 = vld [vmem:[%s2733_s14] sm:$0xff]  ;;  %s2249_s24 = smov 110  }
  0x1b   : > { %819 = vperm.xlu2 %2092, %v816_v11   ;;  %v798_v12 = vld [vmem:[%s773_s25] sm:$0xf]  ;;  %s2250_s25 = smov 127  }
  0x1c   : > { %v802_v4 = vld.sshfl [vmem:[#allocation1] sm:$0xff pattern:$0x75316420]  ;;  %v803_v5 = vld.sshfl [vmem:[#allocation1 + $0x8] sm:$0xff pattern:$0x75316420] }
  0x1d   : > { %908 = vrot.lane.b32.xlu1 %v904_v2, %s2239_s29  ;;  %804 = vrot.lane.b32.xlu0 %v802_v4, %s2239_s29  ;;  %1159 = vst [vmem:[#allocation1] ss:$2 sm:$0xff] %v1157_v3  ;;  %v901_v39 = vld [vmem:[%s2732_s13] sm:$0xff] }
  0x1e   : > { %v1156_v51 = vld [vmem:[%s787_s1] sm:$0xf]  ;;  %s2245_s1 = smov 34  }
  0x1f   : > { %v1172_v56 = vld [vmem:[%s2730_s11] sm:$0xf] }
  0x20   : > { %v1348_v63 = vld [vmem:[%s2735_s16] sm:$0xff] }
  0x21   : > { %v1407_v1 = vld [vmem:[%s2725_s6] ss:$2 sm:$0x3]  ;;  %v2042_v2 = vld [vmem:[%s2725_s6 + $0x1] ss:$2 sm:$0x3] }
  0x22   : > { %v2494_v3 = vperm.slane %v1407_v1, 1  ;;  %v1421_v4 = vperm.slane %v2042_v2, 1  ;;  %v2497_v6 = vperm.slane %v1407_v1, 0 }
  0x23   : > { %1176 = vperm.xlu2 %2092, %v1173_v19  }
  0x24   : > { %v1161_v7 = vld.sshfl [vmem:[#allocation1 + $0x8] sm:$0xff pattern:$0x75316420]  ;;  %v1160_v9 = vld.sshfl [vmem:[#allocation1] sm:$0xff pattern:$0x75316420] }
  0x25   : > { %806 = vrot.lane.b32.xlu0 %v803_v5, %s2239_s29  ;;  %1164 = vrot.lane.b32.xlu1 %v1161_v7, %s2239_s29  ;;  %v1420_v7 = vperm.slane %v2042_v2, 0 }
  0x2b   : > { %1467 = vrot.lane.b32.xlu2 %v2497_v6, %s2241_s26 }
  0x2d   : > { %1162 = vrot.lane.b32.xlu0 %v1160_v9, %s2239_s29  ;;  %1352 = vperm.xlu1 %2094, %v1348_v63   ;;  %s2244_s29 = smov 2  }
  0x33   : > { %1452 = vrot.lane.b32.xlu2 %v1420_v7, %s2242_s27 }
  0x35   : > { %1357 = vperm.xlu0 %2093, %v1349_v0   ;;  %1469 = vrot.lane.b32.xlu1 %v2494_v3, %s2241_s26  ;;  %s2252_s26 = smov 126  }
  0x3b   : > { %1439 = vrot.lane.b32.xlu2 %v2494_v3, %s2243_s28 }
  0x3d   : > { %1454 = vrot.lane.b32.xlu0 %v1421_v4, %s2242_s27  ;;  %1437 = vrot.lane.b32.xlu1 %v2497_v6, %s2243_s28  ;;  %s2253_s27 = smov 94   ;;  %s2753_s28 = sld [smem:[#allocation9_spill]] }
  0x43   : > { %1482 = vrot.lane.b32.xlu2 %v1420_v7, %s2245_s1 }
  0x45   : > { %1422 = vrot.lane.b32.xlu0 %v1420_v7, %s2244_s29  ;;  %1424 = vrot.lane.b32.xlu1 %v1421_v4, %s2244_s29 }
  0x4d   : > { %1484 = vrot.lane.b32.xlu0 %v1421_v4, %s2245_s1 }
  0x6d   : > { %v923_v26 = vpop.permute.xlu2 %922 }
  0x75   : > { %v820_v27 = vpop.permute.xlu2 %819 }
  0x87   : > { %v911_v10 = vpop.permute.xlu1 %910 }
  0x88   : > { %v917_v22 = vsel %vm808_vm0, %v911_v10, %v903_v20 }
  0x8f   : > { %v909_v13 = vpop.permute.xlu1 %908  ;;  %v805_v14 = vpop.permute.xlu0 %804 }
  0x90   : > { %v813_v17 = vsel %vm808_vm0, %v798_v12, %v805_v14  ;;  %v912_v18 = vsel %vm808_vm0, %v909_v13, %v911_v10  ;;  %v916_v25 = vsel %vm808_vm0, %v903_v20, %v909_v13  ;;  %v1177_v10 = vpop.permute.xlu2 %1176 }
  0x91   : > { %2003 = vmatpush.msk.msra.mxu1 %vm826_vm1, %v813_v17  ;;  %964 = vmatpush.msra.mxu0 %v912_v18 }
  0x92   : > { %2004 = vmatmul.msk.f32.vlgmr.msra.gmra.mxu1 %vm822_vm2, %v815_v15  ;;  %2010 = vmatmul.msk.f32.vlgmr.msra.gmra.mxu0 %vm925_vm3, %v918_v16 }
  0x97   : > { %v807_v21 = vpop.permute.xlu0 %806  ;;  %v1165_v34 = vpop.permute.xlu1 %1164 }
  0x98   : > { %v809_v23 = vsel %vm808_vm0, %v805_v14, %v807_v21  ;;  %v814_v24 = vsel %vm808_vm0, %v807_v21, %v798_v12  ;;  %v2464_v57 = vsel %vm808_vm0, %v1165_v34, %v1156_v51 }
  0x99   : > { %2005 = vmatpush.msk.msrb.mxu1 %vm826_vm1, %v809_v23  ;;  %2007 = vmatpush.msk.msra.mxu3 %vm826_vm1, %v814_v24 }
  0x9a   : > { %2006 = vmatmul.msk.f32.vlgmr.msrb.gmra.mxu1 %vm822_vm2, %v815_v15  ;;  %2008 = vmatmul.msk.f32.vlgmr.msra.gmra.mxu3 %vm822_vm2, %v815_v15  ;;  %v1256_v15 = vld [vmem:[%s2734_s15] sm:$0xff] }
  0x9b   : > { %944 = vmatpush.msrb.mxu3 %v916_v25  ;;  %984 = vmatpush.msra.mxu1 %v917_v22 }
  0x9f   : > { %v1163_v35 = vpop.permute.xlu0 %1162 }
  0xa0   : > { %v2436_v40 = vsel %vm808_vm0, %v1163_v35, %v1165_v34  ;;  %v2458_v54 = vsel %vm808_vm0, %v1156_v51, %v1163_v35  ;;  %vm1542_vm0 = vcmask 1031168  }
  0xa2   : > { %2009 = vmatmul.msk.f32.vlgmr.msrb.gmra.mxu3 %vm925_vm3, %v918_v16  ;;  %2011 = vmatmul.msk.f32.vlgmr.msra.gmra.mxu1 %vm925_vm3, %v918_v16 }
 0x10f   : > { %v852_v28 = vpop.f32.mrf.mxu1  ;;  %v966_v29 = vpop.f32.mrf.mxu0 }
 0x110   : > { %v853_v30 = vadd.f32 %v852_v28, %v820_v27  ;;  %v967_v31 = vadd.f32 %v966_v29, %v923_v26 }
 0x112   : > { %v895_v32 = vmax.f32 %v853_v30, 0.0  ;;  %v990_v33 = vmax.f32 %v967_v31, 0.0  ;;  %v2522_v30 = vpop.permute.xlu2 %1467 }
 0x114   : > { %v898_v36 = vmul.f32 %v895_v32, %v813_v17  ;;  %v993_v37 = vmul.f32 %v990_v33, %v912_v18  ;;  %v1257_v17 = vld [vmem:[%s2734_s15 + $0x8] sm:$0xff]  ;;  %v1353_v32 = vpop.permute.xlu1 %1352  ;;  %v2524_v33 = vpop.permute.xlu0 %1357 }
 0x116   : > { %1041 = vmatpush.msra.mxu3 %v993_v37  ;;  %2018 = vmatpush.msk.msrb.mxu1 %vm826_vm1, %v898_v36 }
 0x117   : > { %v872_v41 = vpop.f32.mrf.mxu1  ;;  %2014 = vmatmul.msk.f32.vlgmr.msra.gmra.mxu3 %vm925_vm3, %v995_v38  ;;  %2019 = vmatmul.msk.f32.vlgmr.msrb.gmra.mxu1 %vm822_vm2, %v901_v39 }
 0x118   : > { %2029 = vmatpush.msk.msra.mxu1 %vm826_vm1, %v2436_v40  ;;  %v873_v52 = vadd.f32 %v872_v41, %v820_v27 }
 0x11a   : > { %v896_v59 = vmax.f32 %v873_v52, 0.0  ;;  %v2526_v35 = vpop.permute.xlu2 %1452 }
 0x11c   : > { %v899_v62 = vmul.f32 %v896_v59, %v809_v23  ;;  %v2528_v41 = vpop.permute.xlu1 %1469 }
 0x11d   : > { %v892_v44 = vpop.f32.mrf.mxu3 }
 0x11e   : > { %v893_v45 = vadd.f32 %v892_v44, %v820_v27 }
 0x11f   : > { %v986_v46 = vpop.f32.mrf.mxu1  ;;  %2015 = vmatmul.msk.f32.gmra.mxu3 %vm925_vm3, %v996_v42  ;;  %2020 = vmatmul.msk.f32.gmra.mxu1 %vm822_vm2, %v902_v43 }
 0x120   : > { %v897_v47 = vmax.f32 %v893_v45, 0.0  ;;  %v987_v48 = vadd.f32 %v986_v46, %v923_v26 }
 0x122   : > { %v900_v49 = vmul.f32 %v897_v47, %v814_v24  ;;  %v991_v50 = vmax.f32 %v987_v48, 0.0  ;;  %v2532_v47 = vpop.permute.xlu2 %1439 }
 0x124   : > { %2024 = vmatpush.msk.msrb.mxu3 %vm826_vm1, %v900_v49  ;;  %v994_v53 = vmul.f32 %v991_v50, %v917_v22  ;;  %v2538_v59 = vpop.permute.xlu1 %1437 }
 0x125   : > { %v946_v55 = vpop.f32.mrf.mxu3 }
 0x126   : > { %v947_v58 = vadd.f32 %v946_v55, %v923_v26  ;;  %1064 = vmatpush.msrb.mxu0 %v994_v53 }
 0x127   : > { %2016 = vmatmul.msk.f32.vlgmr.msrb.gmra.mxu0 %vm925_vm3, %v995_v38  ;;  %2025 = vmatmul.msk.f32.vlgmr.msrb.gmra.mxu3 %vm822_vm2, %v901_v39 }
 0x128   : > { %v989_v60 = vmax.f32 %v947_v58, 0.0  ;;  %2030 = vmatmul.msk.f32.vlgmr.msra.gmra.mxu1 %vm822_vm2, %v1172_v56  ;;  %2027 = vmatpush.msk.msra.mxu0 %vm826_vm1, %v2458_v54 }
 0x12a   : > { %2031 = vmatpush.msk.msrb.mxu0 %vm826_vm1, %v2464_v57  ;;  %v992_v61 = vmul.f32 %v989_v60, %v916_v25 }
 0x12c   : > { %1018 = vmatpush.msra.mxu2 %v992_v61 }
 0x12d   : > { %2012 = vmatmul.msk.f32.vlgmr.msra.gmra.mxu2 %vm925_vm3, %v995_v38 }
 0x12e   : > { %2021 = vmatpush.msk.msrb.mxu2 %vm826_vm1, %v899_v62 }
 0x12f   : > { %2017 = vmatmul.msk.f32.gmra.mxu0 %vm925_vm3, %v996_v42  ;;  %2026 = vmatmul.msk.f32.gmra.mxu3 %vm822_vm2, %v902_v43 }
 0x135   : > { %2013 = vmatmul.msk.f32.gmra.mxu2 %vm925_vm3, %v996_v42 }
 0x137   : > { %2028 = vmatmul.msk.f32.vlgmr.msra.gmra.mxu0 %vm822_vm2, %v1172_v56 }
 0x13d   : > { %2022 = vmatmul.msk.f32.vlgmr.msrb.gmra.mxu2 %vm822_vm2, %v901_v39  ;;  %v1372_v39 = vlaneseq }
 0x13f   : > { %2032 = vmatmul.msk.f32.vlgmr.msrb.gmra.mxu0 %vm822_vm2, %v1172_v56  ;;  %v1373_v44 = vand.u32 127, %v1372_v39 }
 0x141   : > { %vm1376_vm4 = vcmp.le.s32.totalorder %v1373_v44, 16 }
 0x145   : > { %2023 = vmatmul.msk.f32.gmra.mxu2 %vm822_vm2, %v902_v43  ;;  %v2530_v43 = vpop.permute.xlu0 %1454 }
 0x14d   : > { %v2540_v61 = vpop.permute.xlu0 %1422 }
 0x194   : > { %v1104_v5 = vpop.f32.mrf.mxu1 }
 0x19a   : > { %v1043_v27 = vpop.f32.mrf.mxu3 }
 0x19c   : > { %v1107_v8 = vpop.f32.mrf.mxu1 }
 0x1a2   : > { %v1046_v29 = vpop.f32.mrf.mxu3 }
 0x1a4   : > { %v1066_v9 = vpop.f32.mrf.mxu0 }
 0x1a5   : > { %v1227_v11 = vpop.f32.mrf.mxu1 }
 0x1a6   : > { %v1228_v12 = vadd.f32 %v1227_v11, %v1177_v10  ;;  %v2565_v11 = vpop.permute.xlu2 %1482 }
 0x1a8   : > { %v1251_v13 = vmax.f32 %v1228_v12, 0.0 }
 0x1aa   : > { %v1254_v14 = vmul.f32 %v1251_v13, %v2436_v40  ;;  %v1150_v34 = vpop.f32.mrf.mxu3 }
 0x1ac   : > { %2036 = vmatpush.msk.msra.mxu2 %vm826_vm1, %v1254_v14  ;;  %v2506_v16 = vpop.f32.mrf.mxu0 }
 0x1ad   : > { %2037 = vmatmul.msk.f32.vlgmr.msra.gmra.mxu2 %vm822_vm2, %v1256_v15 }
 0x1b0   : > { %v1020_v26 = vpop.f32.mrf.mxu2 }
 0x1b1   : > { %v1105_v37 = vadd.f32 %v1104_v5, %v1020_v26 }
 0x1b2   : > { %v1153_v45 = vpop.f32.mrf.mxu3 }
 0x1b4   : > { %v1207_v18 = vpop.f32.mrf.mxu0 }
 0x1b5   : > { %v1208_v19 = vadd.f32 %v1207_v18, %v1177_v10  ;;  %2038 = vmatmul.msk.f32.gmra.mxu2 %vm822_vm2, %v1257_v17 }
 0x1b7   : > { %v1250_v20 = vmax.f32 %v1208_v19, 0.0 }
 0x1b8   : > { %v1023_v28 = vpop.f32.mrf.mxu2 }
 0x1b9   : > { %v1253_v21 = vmul.f32 %v1250_v20, %v2458_v54  ;;  %v1108_v46 = vadd.f32 %v1107_v8, %v1023_v28  ;;  %v1375_v54 = vadd.s32 256, %v1373_v44 }
 0x1bb   : > { %2033 = vmatpush.msk.msrb.mxu1 %vm826_vm1, %v1253_v21  ;;  %vm1388_vm5 = vcmp.ge.s32.totalorder %v1375_v54, 273 }
 0x1bc   : > { %v1247_v22 = vpop.f32.mrf.mxu0  ;;  %2034 = vmatmul.msk.f32.vlgmr.msrb.gmra.mxu1 %vm822_vm2, %v1256_v15 }
 0x1bd   : > { %v1248_v23 = vadd.f32 %v1247_v22, %v1177_v10 }
 0x1bf   : > { %v1252_v24 = vmax.f32 %v1248_v23, 0.0 }
 0x1c0   : > { %v1127_v31 = vpop.f32.mrf.mxu2 }
 0x1c1   : > { %v1255_v25 = vmul.f32 %v1252_v24, %v2464_v57  ;;  %v1128_v50 = vadd.f32 %v1127_v31, %v1043_v27  ;;  %v1151_v57 = vadd.f32 %v1150_v34, %v1066_v9  ;;  %v1154_v27 = vadd.f32 %v1153_v45, %v2506_v16 }
 0x1c3   : > { %2039 = vmatpush.msk.msra.mxu3 %vm826_vm1, %v1255_v25  ;;  %vm1515_vm1 = vcmask 1039360  }
 0x1c4   : > { %2035 = vmatmul.msk.f32.gmra.mxu1 %vm822_vm2, %v1257_v17  ;;  %2040 = vmatmul.msk.f32.vlgmr.msra.gmra.mxu3 %vm822_vm2, %v1256_v15 }
 0x1c8   : > { %v1130_v36 = vpop.f32.mrf.mxu2 }
 0x1c9   : > { %v1131_v58 = vadd.f32 %v1130_v36, %v1046_v29  ;;  %v1472_v36 = vsel %vm1471_vm6, %v2522_v30, %v2528_v41 }
 0x1cc   : > { %2041 = vmatmul.msk.f32.gmra.mxu3 %vm822_vm2, %v1257_v17  ;;  %vm1692_vm2 = vcmask 769024  }
 0x230   : > { %v1313_v48 = vpop.f32.mrf.mxu2 }
 0x231   : > { %v1343_v53 = vadd.f32 %v1313_v48, %v1128_v50 }
 0x233   : > { %v1361_v62 = vadd.f32 %v1353_v32, %v1343_v53 }
 0x235   : > { %v2589_v24 = vmax.f32 %v1361_v62, 0.0 }
 0x238   : > { %v1316_v12 = vpop.f32.mrf.mxu2 }
 0x239   : > { %v1290_v38 = vpop.f32.mrf.mxu1  ;;  %v1346_v25 = vadd.f32 %v1316_v12, %v1131_v58 }
 0x23a   : > { %v1342_v40 = vadd.f32 %v1290_v38, %v1105_v37 }
 0x23b   : > { %v1364_v34 = vadd.f32 %v2524_v33, %v1346_v25 }
 0x23c   : > { %v1360_v42 = vadd.f32 %v1353_v32, %v1342_v40  ;;  %v1477_v40 = vmul.f32 %v1472_v36, %v2589_v24 }
 0x23d   : > { %v2609_v39 = vmax.f32 %v1364_v34, 0.0 }
 0x23e   : > { %v1366_v49 = vmax.f32 %v1360_v42, 0.0 }
 0x23f   : > { %v1480_v50 = vmul.f32 %v1472_v36, %v2609_v39 }
 0x240   : > { %v2535_v55 = vsel %vm1376_vm4, 0.0, %v1366_v49 }
 0x241   : > { %v1293_v51 = vpop.f32.mrf.mxu1  ;;  %v1476_v0 = vmul.f32 %v2522_v30, %v2535_v55  ;;  %v1461_v1 = vmul.f32 %v2526_v35, %v2535_v55  ;;  %v2551_v5 = vmul.f32 %v2538_v59, %v2535_v55  ;;  %v2555_v7 = vmul.f32 %v2540_v61, %v2535_v55 }
 0x242   : > { %v1345_v52 = vadd.f32 %v1293_v51, %v1108_v46  ;;  %v2579_v19 = vmul.f32 %v2565_v11, %v2535_v55  ;;  %v1442_v51 = vsel %vm1441_vm8, %v2538_v59, %v2532_v47 }
 0x243   : > { %v1447_v54 = vmul.f32 %v1442_v51, %v2589_v24 }
 0x244   : > { %v1363_v56 = vadd.f32 %v2524_v33, %v1345_v52 }
 0x246   : > { %v1369_v60 = vmax.f32 %v1363_v56, 0.0  ;;  %v1425_v56 = vpop.permute.xlu1 %1424 }
 0x247   : > { %v1336_v63 = vpop.f32.mrf.mxu3 }
 0x248   : > { %v2547_v2 = vsel %vm1376_vm4, 0.0, %v1369_v60  ;;  %v1344_v4 = vadd.f32 %v1336_v63, %v1151_v57  ;;  %v1450_v63 = vmul.f32 %v1442_v51, %v2609_v39 }
 0x249   : > { %v2559_v8 = vpack.i.bf16 %v2535_v55, %v2547_v2  ;;  %v1479_v9 = vmul.f32 %v2522_v30, %v2547_v2  ;;  %v1464_v10 = vmul.f32 %v2526_v35, %v2547_v2  ;;  %v2569_v14 = vmul.f32 %v2538_v59, %v2547_v2 }
 0x24a   : > { %v1362_v13 = vadd.f32 %v1353_v32, %v1344_v4  ;;  %v2573_v15 = vmul.f32 %v2540_v61, %v2547_v2  ;;  %v2583_v20 = vmul.f32 %v2565_v11, %v2547_v2  ;;  %v1457_v30 = vsel %vm1456_vm7, %v2526_v35, %v2530_v43  ;;  %v1485_v4 = vpop.permute.xlu0 %1484 }
 0x24b   : > { %2096 = vrot.lane.b32.xlu2 %v2559_v8, %s2246_s22  ;;  %v2100_v17 = vpack.i.bf16 %v1476_v0, %v1479_v9  ;;  %v2105_v18 = vpack.i.bf16 %v1461_v1, %v1464_v10  ;;  %v2150_v22 = vpack.i.bf16 %v2551_v5, %v2569_v14  ;;  %v1462_v46 = vmul.f32 %v1457_v30, %v2589_v24 }
 0x24c   : > { %v1368_v21 = vmax.f32 %v1362_v13, 0.0  ;;  %v2160_v23 = vpack.i.bf16 %v2555_v7, %v2573_v15  ;;  %v2210_v26 = vpack.i.bf16 %v2579_v19, %v2583_v20  ;;  %v1427_v59 = vsel %vm1426_vm9, %v2540_v61, %v1425_v56 }
 0x24d   : > { %v1432_v62 = vmul.f32 %v1427_v59, %v2589_v24  ;;  %v1435_v5 = vmul.f32 %v1427_v59, %v2609_v39 }
 0x24e   : > { %v2595_v28 = vsel %vm1388_vm5, 0.0, %v1368_v21 }
 0x24f   : > { %v1339_v29 = vpop.f32.mrf.mxu3  ;;  %v2599_v31 = vpack.i.bf16 %v2595_v28, %v2589_v24  ;;  %v1478_v37 = vmul.f32 %v2528_v41, %v2595_v28  ;;  %v1448_v53 = vmul.f32 %v2532_v47, %v2595_v28  ;;  %v1493_v9 = vmul.f32 %v1485_v4, %v2595_v28 }
 0x250   : > { %v1347_v32 = vadd.f32 %v1339_v29, %v1154_v27 }
 0x251   : > { %2116 = vrot.lane.b32.xlu1 %v2599_v31, %s2247_s21  ;;  %v2120_v44 = vpack.i.bf16 %v1478_v37, %v1477_v40  ;;  %v2135_v58 = vpack.i.bf16 %v1448_v53, %v1447_v54 }
 0x252   : > { %v1365_v16 = vadd.f32 %v2524_v33, %v1347_v32  ;;  %v1463_v33 = vmul.f32 %v2530_v43, %v2595_v28 }
 0x253   : > { %2101 = vrot.lane.b32.xlu2 %v2100_v17, %s2248_s23  ;;  %v1705_v17 = vld [vmem:[%s2737_s18] sm:$0xff] }
 0x254   : > { %v1371_v38 = vmax.f32 %v1365_v16, 0.0  ;;  %v2125_v48 = vpack.i.bf16 %v1463_v33, %v1462_v46 }
 0x256   : > { %v1406_v42 = vsel %vm1388_vm5, 0.0, %v1371_v38 }
 0x257   : > { %v2165_v45 = vpack.i.bf16 %v1406_v42, %v2609_v39  ;;  %v1481_v49 = vmul.f32 %v2528_v41, %v1406_v42  ;;  %v1466_v52 = vmul.f32 %v2530_v43, %v1406_v42  ;;  %v1465_v41 = vmul.f32 %v1457_v30, %v2609_v39 }
 0x258   : > { %v1451_v60 = vmul.f32 %v2532_v47, %v1406_v42  ;;  %v1433_v43 = vmul.f32 %v1425_v56, %v2595_v28  ;;  %v1436_v61 = vmul.f32 %v1425_v56, %v1406_v42  ;;  %v1487_v47 = vsel %vm1486_vm10, %v2565_v11, %v1485_v4  ;;  %v1706_v11 = vld [vmem:[%s2737_s18 + $0x8] sm:$0xff] }
 0x259   : > { %2121 = vrot.lane.b32.xlu1 %v2120_v44, %s2248_s23  ;;  %2166 = vrot.lane.b32.xlu0 %v2165_v45, %s2247_s21  ;;  %v2175_v35 = vpack.i.bf16 %v1481_v49, %v1480_v50  ;;  %v2180_v57 = vpack.i.bf16 %v1466_v52, %v1465_v41  ;;  %v1492_v10 = vmul.f32 %v1487_v47, %v2589_v24 }
 0x25a   : > { %v2185_v0 = vpack.i.bf16 %v1451_v60, %v1450_v63  ;;  %v2145_v1 = vpack.i.bf16 %v1433_v43, %v1432_v62  ;;  %v2190_v12 = vpack.i.bf16 %v1436_v61, %v1435_v5  ;;  %v1496_v14 = vmul.f32 %v1485_v4, %v1406_v42 }
 0x25b   : > { %2106 = vrot.lane.b32.xlu2 %v2105_v18, %s2249_s24  ;;  %v2205_v13 = vpack.i.bf16 %v1493_v9, %v1492_v10  ;;  %v1495_v7 = vmul.f32 %v1487_v47, %v2609_v39 }
 0x25d   : > { %v2200_v15 = vpack.i.bf16 %v1496_v14, %v1495_v7 }
 0x261   : > { %2171 = vrot.lane.b32.xlu0 %v2165_v45, %s2250_s25  ;;  %2126 = vrot.lane.b32.xlu1 %v2125_v48, %s2249_s24 }
 0x263   : > { %2111 = vrot.lane.b32.xlu2 %v2599_v31, %s2246_s22 }
 0x269   : > { %2176 = vrot.lane.b32.xlu0 %v2175_v35, %s2248_s23  ;;  %2131 = vrot.lane.b32.xlu1 %v2165_v45, %s2246_s22 }
 0x26b   : > { %2141 = vrot.lane.b32.xlu2 %v2559_v8, %s2247_s21 }
 0x271   : > { %2181 = vrot.lane.b32.xlu0 %v2180_v57, %s2249_s24  ;;  %2136 = vrot.lane.b32.xlu1 %v2135_v58, %s2251_s3 }
 0x273   : > { %2151 = vrot.lane.b32.xlu2 %v2150_v22, %s2251_s3 }
 0x279   : > { %2186 = vrot.lane.b32.xlu0 %v2185_v0, %s2251_s3  ;;  %2146 = vrot.lane.b32.xlu1 %v2145_v1, %s2252_s26  ;;  %s2052_s3 = sshll.u32 %s2760_s0, 5 }
 0x27a   : > { %s796_s29 = scalar_lea.vmem %s2753_s28, %s2052_s3 }
 0x27b   : > { %2161 = vrot.lane.b32.xlu2 %v2160_v23, %s2252_s26 }
 0x281   : > { %2191 = vrot.lane.b32.xlu0 %v2190_v12, %s2252_s26  ;;  %2156 = vrot.lane.b32.xlu1 %v2599_v31, %s2250_s25 }
 0x283   : > { %2206 = vrot.lane.b32.xlu2 %v2205_v13, %s2253_s27 }
 0x289   : > { %2196 = vrot.lane.b32.xlu0 %v2559_v8, %s2250_s25  ;;  %2201 = vrot.lane.b32.xlu1 %v2200_v15, %s2253_s27 }
 0x28b   : > { %1714 = vperm.xlu2 %2092, %v1706_v11  }
 0x291   : > { %2211 = vrot.lane.b32.xlu0 %v2210_v26, %s2253_s27  ;;  %1709 = vperm.xlu1 %2094, %v1705_v17  }
 0x2a5   : > { %v2097_v18 = vpop.permute.xlu2 %2096 }
 0x2a6   : > { %v2098_v31 = vunpack.i.l.bf16 %v2097_v18  ;;  %v2099_v37 = vunpack.i.h.bf16 %v2097_v18 }
 0x2ad   : > { %v2102_v21 = vpop.permute.xlu2 %2101 }
 0x2ae   : > { %v2103_v33 = vunpack.i.l.bf16 %v2102_v21  ;;  %v2104_v49 = vunpack.i.h.bf16 %v2102_v21 }
 0x2b5   : > { %v2107_v23 = vpop.permute.xlu2 %2106 }
 0x2b6   : > { %v2108_v51 = vunpack.i.l.bf16 %v2107_v23  ;;  %v2109_v60 = vunpack.i.h.bf16 %v2107_v23 }
 0x2bd   : > { %v2112_v8 = vpop.permute.xlu2 %2111 }
 0x2be   : > { %v2114_v36 = vunpack.i.h.bf16 %v2112_v8  ;;  %v2113_v16 = vunpack.i.l.bf16 %v2112_v8 }
 0x2c0   : > { %v1666_v46 = vsel %vm1665_vm11, %v2099_v37, %v2113_v16  ;;  %v1667_v48 = vsel %vm1665_vm11, %v2113_v16, %v2114_v36 }
 0x2c3   : > { %v2662_v22 = vpop.permute.xlu1 %2116 }
 0x2c4   : > { %v2119_v4 = vunpack.i.h.bf16 %v2662_v22  ;;  %v2118_v61 = vunpack.i.l.bf16 %v2662_v22 }
 0x2c5   : > { %v2142_v19 = vpop.permute.xlu2 %2141 }
 0x2c6   : > { %v2144_v47 = vunpack.i.h.bf16 %v2142_v19  ;;  %v2143_v5 = vunpack.i.l.bf16 %v2142_v19  ;;  %v1592_v17 = vsel %vm1590_vm14, %v2118_v61, %v2119_v4 }
 0x2c8   : > { %v1591_v11 = vsel %vm1590_vm14, %v2144_v47, %v2118_v61 }
 0x2cb   : > { %v2122_v25 = vpop.permute.xlu1 %2121  ;;  %v2664_v27 = vpop.permute.xlu0 %2166 }
 0x2cc   : > { %v2124_v45 = vunpack.i.h.bf16 %v2122_v25  ;;  %v2123_v30 = vunpack.i.l.bf16 %v2122_v25  ;;  %v2169_v43 = vunpack.i.h.bf16 %v2664_v27  ;;  %v2168_v62 = vunpack.i.l.bf16 %v2664_v27 }
 0x2cd   : > { %v2152_v63 = vpop.permute.xlu2 %2151 }
 0x2ce   : > { %v1645_v41 = vsel %vm1644_vm12, %v2104_v49, %v2123_v30  ;;  %v1646_v54 = vsel %vm1644_vm12, %v2123_v30, %v2124_v45  ;;  %v1593_v12 = vsel %vm1590_vm14, %v2143_v5, %v2168_v62  ;;  %v1594_v13 = vsel %vm1590_vm14, %v2168_v62, %v2169_v43  ;;  %v1701_v62 = vld [vmem:[%s2736_s17] sm:$0xff] }
 0x2cf   : > { %v2153_v14 = vunpack.i.l.bf16 %v2152_v63  ;;  %v2154_v25 = vunpack.i.h.bf16 %v2152_v63  ;;  %v1416_v43 = vmul.f32 %v2494_v3, %v2589_v24  ;;  %v1415_v24 = vmul.f32 %v2497_v6, %v2535_v55 }
 0x2d3   : > { %v2127_v28 = vpop.permute.xlu1 %2126  ;;  %v2666_v29 = vpop.permute.xlu0 %2171 }
 0x2d4   : > { %v2129_v56 = vunpack.i.h.bf16 %v2127_v28  ;;  %v2128_v57 = vunpack.i.l.bf16 %v2127_v28 }
 0x2d5   : > { %v2162_v28 = vpop.permute.xlu2 %2161 }
 0x2d6   : > { %v1618_v9 = vsel %vm1617_vm13, %v2109_v60, %v2128_v57  ;;  %v1619_v10 = vsel %vm1617_vm13, %v2128_v57, %v2129_v56 }
 0x2db   : > { %v2132_v32 = vpop.permute.xlu1 %2131  ;;  %v2177_v34 = vpop.permute.xlu0 %2176 }
 0x2dc   : > { %v2134_v20 = vunpack.i.h.bf16 %v2132_v32  ;;  %v2133_v26 = vunpack.i.l.bf16 %v2132_v32  ;;  %v2179_v38 = vunpack.i.h.bf16 %v2177_v34  ;;  %v2178_v40 = vunpack.i.l.bf16 %v2177_v34 }
 0x2dd   : > { %v2163_v34 = vunpack.i.l.bf16 %v2162_v28  ;;  %v2207_v49 = vpop.permute.xlu2 %2206 }
 0x2de   : > { %v1668_v42 = vsel %vm1665_vm11, %v2098_v31, %v2133_v26  ;;  %v1669_v44 = vsel %vm1665_vm11, %v2133_v26, %v2134_v20  ;;  %v1647_v50 = vsel %vm1644_vm12, %v2103_v33, %v2178_v40  ;;  %v1648_v35 = vsel %vm1644_vm12, %v2178_v40, %v2179_v38 }
 0x2df   : > { %1723 = vmatpush.msra.mxu0 %v1668_v42  ;;  %1769 = vmatpush.msrb.mxu2 %v1669_v44  ;;  %v2174_v38 = vunpack.i.h.bf16 %v2666_v29  ;;  %v2173_v40 = vunpack.i.l.bf16 %v2666_v29  ;;  %v2164_v42 = vunpack.i.h.bf16 %v2162_v28  ;;  %v2209_v56 = vunpack.i.h.bf16 %v2207_v49 }
 0x2e0   : > { %v2208_v57 = vunpack.i.l.bf16 %v2207_v49 }
 0x2e1   : > { %1724 = vmatpush.msra.mxu0 %v1666_v46  ;;  %1770 = vmatpush.msrb.mxu2 %v1667_v48 }
 0x2e3   : > { %v2137_v52 = vpop.permute.xlu1 %2136  ;;  %v2182_v53 = vpop.permute.xlu0 %2181  ;;  %1725 = vmatpush.msra.mxu0 %v1647_v50  ;;  %1771 = vmatpush.msrb.mxu2 %v1648_v35  ;;  %v1519_v50 = vsel %vm1515_vm1, %v2173_v40, %v2174_v38 }
 0x2e4   : > { %v2184_v58 = vunpack.i.h.bf16 %v2182_v53  ;;  %v2183_v59 = vunpack.i.l.bf16 %v2182_v53  ;;  %v2139_v18 = vunpack.i.h.bf16 %v2137_v52  ;;  %v2138_v21 = vunpack.i.l.bf16 %v2137_v52 }
 0x2e5   : > { %1726 = vmatpush.msra.mxu0 %v1645_v41  ;;  %1772 = vmatpush.msrb.mxu2 %v1646_v54 }
 0x2e6   : > { %v1620_v0 = vsel %vm1617_vm13, %v2108_v51, %v2183_v59  ;;  %v1621_v1 = vsel %vm1617_vm13, %v2183_v59, %v2184_v58  ;;  %v1570_v31 = vsel %vm1569_vm15, %v2154_v25, %v2138_v21  ;;  %v1571_v32 = vsel %vm1569_vm15, %v2138_v21, %v2139_v18  ;;  %v1715_v18 = vpop.permute.xlu2 %1714 }
 0x2e7   : > { %1727 = vmatpush.msra.mxu0 %v1620_v0  ;;  %1773 = vmatpush.msrb.mxu2 %v1621_v1  ;;  %v1418_v58 = vmul.f32 %v2494_v3, %v2609_v39  ;;  %v1702_v39 = vld [vmem:[%s2736_s17 + $0x8] sm:$0xff]  ;;  %v1694_v0 = vsel %vm1692_vm2, %v2208_v57, %v2209_v56  ;;  %v1417_v1 = vmul.f32 %v2497_v6, %v2547_v2  ;;  %v1703_v2 = vld [vmem:[%s2736_s17 + $0x10] sm:$0xff] }
 0x2e9   : > { %1728 = vmatpush.msra.mxu0 %v1618_v9  ;;  %1774 = vmatpush.msrb.mxu2 %v1619_v10  ;;  %v1704_v9 = vld [vmem:[%s2736_s17 + $0x18] sm:$0xff] }
 0x2eb   : > { %v2147_v7 = vpop.permute.xlu1 %2146  ;;  %v2187_v15 = vpop.permute.xlu0 %2186  ;;  %1729 = vmatpush.msra.mxu0 %v1593_v12  ;;  %1775 = vmatpush.msrb.mxu2 %v1594_v13 }
 0x2ec   : > { %v2189_v22 = vunpack.i.h.bf16 %v2187_v15  ;;  %v2188_v23 = vunpack.i.l.bf16 %v2187_v15  ;;  %v2149_v19 = vunpack.i.h.bf16 %v2147_v7  ;;  %v2148_v20 = vunpack.i.l.bf16 %v2147_v7 }
 0x2ed   : > { %1730 = vmatpush.msra.mxu0 %v1591_v11  ;;  %1776 = vmatpush.msrb.mxu2 %v1592_v17 }
 0x2ee   : > { %v1572_v27 = vsel %vm1569_vm15, %v2153_v14, %v2188_v23  ;;  %v1573_v8 = vsel %vm1569_vm15, %v2188_v23, %v2189_v22  ;;  %v1543_v46 = vsel %vm1542_vm0, %v2164_v42, %v2148_v20  ;;  %v1544_v48 = vsel %vm1542_vm0, %v2148_v20, %v2149_v19 }
 0x2ef   : > { %1731 = vmatpush.msra.mxu0 %v1572_v27  ;;  %1777 = vmatpush.msrb.mxu2 %v1573_v8 }
 0x2f1   : > { %1732 = vmatpush.msra.mxu0 %v1570_v31  ;;  %1778 = vmatpush.msrb.mxu2 %v1571_v32 }
 0x2f3   : > { %v2157_v36 = vpop.permute.xlu1 %2156  ;;  %v2192_v16 = vpop.permute.xlu0 %2191 }
 0x2f4   : > { %v2194_v26 = vunpack.i.h.bf16 %v2192_v16  ;;  %v2193_v37 = vunpack.i.l.bf16 %v2192_v16  ;;  %v2159_v30 = vunpack.i.h.bf16 %v2157_v36  ;;  %v2158_v33 = vunpack.i.l.bf16 %v2157_v36 }
 0x2f6   : > { %v1545_v44 = vsel %vm1542_vm0, %v2163_v34, %v2193_v37  ;;  %v1546_v45 = vsel %vm1542_vm0, %v2193_v37, %v2194_v26  ;;  %v1517_v29 = vsel %vm1515_vm1, %v2158_v33, %v2159_v30 }
 0x2f7   : > { %1733 = vmatpush.msra.mxu0 %v1545_v44  ;;  %1779 = vmatpush.msrb.mxu2 %v1546_v45 }
 0x2f9   : > { %1734 = vmatpush.msra.mxu0 %v1543_v46  ;;  %1780 = vmatpush.msrb.mxu2 %v1544_v48 }
 0x2fb   : > { %v2202_v35 = vpop.permute.xlu1 %2201  ;;  %v2197_v51 = vpop.permute.xlu0 %2196  ;;  %1781 = vmatpush.msrb.mxu2 %v1519_v50 }
 0x2fc   : > { %v2204_v52 = vunpack.i.h.bf16 %v2202_v35  ;;  %v2203_v53 = vunpack.i.l.bf16 %v2202_v35  ;;  %v2199_v41 = vunpack.i.h.bf16 %v2197_v51  ;;  %v2198_v54 = vunpack.i.l.bf16 %v2197_v51 }
 0x2fd   : > { %1782 = vmatpush.msrb.mxu2 %v1517_v29 }
 0x2fe   : > { %v1518_v59 = vsel %vm1515_vm1, %v2198_v54, %v2173_v40  ;;  %v1696_v60 = vsel %vm1692_vm2, %v2203_v53, %v2204_v52  ;;  %v1516_v63 = vsel %vm1515_vm1, %v2199_v41, %v2158_v33 }
 0x2ff   : > { %1735 = vmatpush.msra.mxu0 %v1518_v59  ;;  %1783 = vmatpush.msrb.mxu2 %v1418_v58 }
 0x300   : > { %1806 = vmatpush.msrb.mxu3 %v1696_v60 }
 0x301   : > { %1736 = vmatpush.msra.mxu0 %v1516_v63  ;;  %1784 = vmatpush.msrb.mxu2 %v1416_v43 }
 0x302   : > { %1807 = vmatpush.msrb.mxu3 %v1694_v0  ;;  %1785 = vmatmul.f32.vlgmr.msrb.gmra.mxu2 %v1701_v62 }
 0x303   : > { %v2212_v3 = vpop.permute.xlu0 %2211  ;;  %1737 = vmatpush.msra.mxu0 %v1417_v1  ;;  %2045 = vmatmul.msk.f32.vlgmr.msrb.gmra.mxu3 %vm1441_vm8, %v1702_v39  ;;  %v1710_v55 = vpop.permute.xlu1 %1709 }
 0x304   : > { %v2214_v4 = vunpack.i.h.bf16 %v2212_v3  ;;  %v2213_v61 = vunpack.i.l.bf16 %v2212_v3 }
 0x305   : > { %1738 = vmatpush.msra.mxu0 %v1415_v24 }
 0x306   : > { %1739 = vmatmul.f32.vlgmr.msra.gmra.mxu0 %v1701_v62  ;;  %v1695_v47 = vsel %vm1692_vm2, %v2213_v61, %v2203_v53  ;;  %v1693_v5 = vsel %vm1692_vm2, %v2214_v4, %v2208_v57 }
 0x307   : > { %1760 = vmatpush.msra.mxu1 %v1695_v47 }
 0x309   : > { %1761 = vmatpush.msra.mxu1 %v1693_v5 }
 0x30a   : > { %2043 = vmatmul.msk.f32.vlgmr.msra.gmra.mxu1 %vm1441_vm8, %v1702_v39  ;;  %1788 = vmatmul.f32.gmra.mxu2 %v1703_v2 }
 0x30b   : > { %2046 = vmatmul.msk.f32.gmra.mxu3 %vm1441_vm8, %v1704_v9 }
 0x30e   : > { %1742 = vmatmul.f32.gmra.mxu0 %v1703_v2 }
 0x312   : > { %2044 = vmatmul.msk.f32.gmra.mxu1 %vm1441_vm8, %v1704_v9 }
 0x383   : > { %v1740_v6 = vpop.f32.mrf.mxu0 }
 0x384   : > { %v1741_v12 = vadd.f32 %v1740_v6, %v1710_v55 }
 0x385   : > { %v1786_v10 = vpop.f32.mrf.mxu2 }
 0x386   : > { %v1787_v13 = vadd.f32 %v1786_v10, %v1710_v55  ;;  %v1809_v14 = vpop.f32.mrf.mxu3 }
 0x387   : > { %v1763_v7 = vpop.f32.mrf.mxu1 }
 0x388   : > { %v1764_v15 = vadd.f32 %v1763_v7, %v1741_v12  ;;  %v1810_v11 = vadd.f32 %v1809_v14, %v1787_v13 }
 0x38a   : > { %1815 = vst [vmem:[%s796_s29] sm:$0xff] %v1764_v15 }
 0x38b   : > { %1816 = vst [vmem:[%s796_s29 + $0x8] sm:$0xff] %v1810_v11  ;;  %v1743_v17 = vpop.f32.mrf.mxu0 }
 0x38c   : > { %v1744_v22 = vadd.f32 %v1743_v17, %v1715_v18 }
 0x38d   : > { %v1789_v21 = vpop.f32.mrf.mxu2 }
 0x38e   : > { %v1790_v23 = vadd.f32 %v1789_v21, %v1715_v18  ;;  %v1812_v25 = vpop.f32.mrf.mxu3 }
 0x38f   : > { %v1766_v27 = vpop.f32.mrf.mxu1 }
 0x390   : > { %v1767_v8 = vadd.f32 %v1766_v27, %v1744_v22  ;;  %v1813_v28 = vadd.f32 %v1812_v25, %v1790_v23 }
 0x392   : > { %1817 = vst [vmem:[%s796_s29 + $0x10] sm:$0xff] %v1767_v8 }
 0x393   : > { %1818 = vst [vmem:[%s796_s29 + $0x18] sm:$0xff] %v1813_v28 }
 0x394 PF: > { %s2754_s0 = sld [smem:[#allocation3_spill]] }
 0x395   : > { %s2756_s30 = sld [smem:[#allocation4_spill]] }
 0x39a   : > { %s29_s20 = sadd.s32 1, %s2754_s0   ;;  %s2755_s0 = sld [smem:[#allocation2_spill]] }
 0x39b   : > { %p26_p5 = scmp.ge.s32.totalorder %s29_s20, 4  }
 0x39d   :  { %28 = sbr.rel (!%p26_p5) target bundleno = 6 (0x6), region = 142 }

</bundles_post_ra>
